<compile_context>
chip_gen: v7x
topology: tpu7x:2x2x1
jax: 0.10.0
libtpu: 0.0.40
codegen_flags: <defaults>
</compile_context>

<pallas_src>
import jax
import jax.numpy as jnp
from jax.experimental import pallas as pl
from jax.experimental.pallas import tpu as pltpu

LANE = 128


def _round_up(x, m):
    return (x + m - 1) // m * m


def mlp5_kernel(x_ref, w_ref, b_ref, o_ref):
    """Fused 6-layer MLP (ReLU after the first 5 layers).

    x_ref : [tile, n_in]   unpadded input features (f32)
    w_ref : [L, D, D]      per-layer weights, pre-transposed to [in, out],
                           zero-padded to D=128 lanes (bf16 or f32)
    b_ref : [Lp, D]        per-layer biases (f32), zero-padded (Lp >= L)
    o_ref : [tile, n_out]  narrow output block (real output width only)
    """
    n_layers = w_ref.shape[0]
    n_in = x_ref.shape[1]
    n_out = o_ref.shape[1]

    # Layer 0: contract over the real (unpadded) input width; padded weight
    # rows [n_in:, :] are never touched, so no input padding is needed at all.
    h = jnp.dot(x_ref[...].astype(w_ref.dtype), w_ref[0, :n_in, :],
                preferred_element_type=jnp.float32)
    h = jnp.maximum(h + b_ref[0:1, :], 0.0)          # f32 bias + ReLU (VPU)

    # Layers 1 .. L-2: uniform [tile,128] @ [128,128] MXU ops, f32 epilogue.
    for l in range(1, n_layers - 1):                  # unrolled at trace time
        y = jnp.dot(h.astype(w_ref.dtype), w_ref[l],
                    preferred_element_type=jnp.float32)
        h = jnp.maximum(y + b_ref[l:l + 1, :], 0.0)

    # Final layer (no ReLU): compute full width, store only the real lanes.
    l = n_layers - 1
    y = jnp.dot(h.astype(w_ref.dtype), w_ref[l],
                preferred_element_type=jnp.float32) + b_ref[l:l + 1, :]
    o_ref[...] = y[:, :n_out].astype(o_ref.dtype)


def pack_params(params, *, weight_dtype=jnp.bfloat16):
    """Pack torch-style [(W[out,in], b[out]), ...] into padded VMEM slabs.

    Returns (w_all [L,D,D] weight_dtype, b_all [Lp,D] f32, n_output).
    The W.T transpose is done ONCE here, not on the forward hot path.
    """
    dims = [params[0][0].shape[1]] + [W.shape[0] for (W, _) in params]
    D = max(LANE, _round_up(max(dims), LANE))
    L = len(params)
    Lp = max(L, 8)
    w_all = jnp.zeros((L, D, D), jnp.float32)
    b_all = jnp.zeros((Lp, D), jnp.float32)
    for l, (W, b) in enumerate(params):
        out_d, in_d = W.shape
        w_all = w_all.at[l, :in_d, :out_d].set(W.T)   # [in, out], padded = 0
        b_all = b_all.at[l, :out_d].set(b)            # padded lanes = 0
    return w_all.astype(weight_dtype), b_all, params[-1][0].shape[0]


def _choose_batch_tile(B, sub=8):
    """Batch-tile heuristic.

    tiny B        -> single tile (cannot split `sub` rows)
    small/med B   -> split into 2 tiles so the 'parallel' grid axis can be
                     sharded across both v7x TensorCores (no effect v5e/v6e)
    large B       -> 512-1024 row tiles (roofline sweet spot), preferring an
                     exact divisor of the rounded batch to avoid pad waste.
    """
    Bs = _round_up(B, sub)
    if Bs <= sub:
        return Bs
    if Bs <= 2048:
        return _round_up((Bs + 1) // 2, sub)
    for t in range(1024, 511, -sub):
        if Bs % t == 0:
            return t
    return 1024


def mlp5_forward(x, packed, *, batch_tile=None):
    """x: [B, n_input] f32. packed: output of pack_params."""
    w_all, b_all, n_output = packed
    B, n_in = x.shape
    L, D, _ = w_all.shape

    # Min sublane tile depends on the I/O dtype (8 for f32, 16 for bf16).
    sub = 8 if jnp.dtype(x.dtype).itemsize >= 4 else 16
    if batch_tile is None:
        batch_tile = _choose_batch_tile(B, sub)
    batch_tile = max(sub, _round_up(min(batch_tile, _round_up(B, sub)), sub))
    B_pad = _round_up(B, batch_tile)

    # Only pad the (narrow) batch dim, and only when the tile doesn't divide B.
    x_in = x if B_pad == B else jnp.pad(x, ((0, B_pad - B), (0, 0)))

    # Explicit VMEM budget: resident weight/bias slabs + double-buffered
    # narrow in/out blocks + activation working set, with generous headroom.
    w_bytes = w_all.size * jnp.dtype(w_all.dtype).itemsize
    b_bytes = b_all.size * jnp.dtype(b_all.dtype).itemsize
    io_bytes = 2 * batch_tile * (n_in + n_output) * 4
    act_bytes = 2 * batch_tile * D * 4
    vmem_limit = int(min(48 * 2 ** 20,
                         max(16 * 2 ** 20,
                             4 * (w_bytes + b_bytes + io_bytes + act_bytes))))

    out = pl.pallas_call(
        mlp5_kernel,
        out_shape=jax.ShapeDtypeStruct((B_pad, n_output), x.dtype),
        grid_spec=pltpu.PrefetchScalarGridSpec(
            num_scalar_prefetch=0,
            grid=(B_pad // batch_tile,),
            in_specs=[
                # Unpadded input lanes: last block dim == full array dim.
                pl.BlockSpec((batch_tile, n_in), lambda i: (i, 0)),
                # Single packed weight slab + single bias slab, constant index
                # -> resident in VMEM across all batch tiles.
                pl.BlockSpec(w_all.shape, lambda i: (0, 0, 0)),
                pl.BlockSpec(b_all.shape, lambda i: (0, 0)),
            ],
            # Narrow output block: last block dim == full array dim (n_output).
            out_specs=pl.BlockSpec((batch_tile, n_output), lambda i: (i, 0)),
        ),
        compiler_params=pltpu.CompilerParams(
            dimension_semantics=("parallel",),
            vmem_limit_bytes=vmem_limit),
    )(x_in, w_all, b_all)

    return out if B_pad == B else out[:B]


def init_params(key, dims):
    """dims = [n_input, h1, h2, h3, h4, h5, n_output] -> list of (W, b)."""
    params = []
    for i in range(len(dims) - 1):
        key, kw, kb = jax.random.split(key, 3)
        fan_in, fan_out = dims[i], dims[i + 1]
        # torch.nn.Linear default init: U(-1/sqrt(fan_in), 1/sqrt(fan_in))
        bound = 1.0 / jnp.sqrt(fan_in)
        W = jax.random.uniform(kw, (fan_out, fan_in), jnp.float32, -bound, bound)
        b = jax.random.uniform(kb, (fan_out,), jnp.float32, -bound, bound)
        params.append((W, b))
    return params


def mlp5_reference(x, params):
    h = x
    for i, (W, b) in enumerate(params):
        h = h @ W.T + b
        if i < len(params) - 1:
            h = jnp.maximum(h, 0.0)
    return h


if __name__ == "__main__":
    key = jax.random.PRNGKey(0)

    # MLP5Layer(n_input=32, h1=64, h2=64, h3=32, h4=32, h5=16, n_output=8)
    dims = [32, 64, 64, 32, 32, 16, 8]
    batch = 16

    key, kx = jax.random.split(key)
    x = jax.random.normal(kx, (batch, dims[0]), jnp.float32)
    params = init_params(key, dims)

    ref = mlp5_reference(x, params)

    # f32-weight path: exact-ish check against the reference.
    packed_f32 = pack_params(params, weight_dtype=jnp.float32)
    out_f32 = jax.block_until_ready(mlp5_forward(x, packed_f32))
    assert out_f32.shape == (batch, dims[-1])
    assert jnp.allclose(out_f32, ref, atol=1e-4, rtol=1e-4), "f32 path mismatch"

    # bf16-weight path (default fast path): bf16 weights/activations into the
    # MXU, f32 accumulation via preferred_element_type -> loose tolerance.
    packed_bf16 = pack_params(params, weight_dtype=jnp.bfloat16)
    out_bf16 = jax.block_until_ready(mlp5_forward(x, packed_bf16))
    assert out_bf16.shape == (batch, dims[-1])
    assert jnp.allclose(out_bf16, ref, atol=5e-2, rtol=5e-2), "bf16 path mismatch"

    print("KERNEL_OK")
</pallas_src>

<mosaic_0001>
module attributes {stable_mosaic.version = 11 : i64} {
  func.func @mlp5_kernel(%arg0: i32, %arg1: memref<8x32xf32, #tpu.memory_space<vmem>>, %arg2: memref<6x128x128xf32, #tpu.memory_space<vmem>>, %arg3: memref<8x128xf32, #tpu.memory_space<vmem>>, %arg4: memref<8x8xf32, #tpu.memory_space<vmem>>) attributes {dimension_semantics = [#tpu.dimension_semantics<parallel>], iteration_bounds = array<i64: 2>, scalar_prefetch = 0 : i64, scratch_operands = 0 : i64, tpu.core_type = #tpu.core_type<tc>, window_params = [{transform_indices = @transform_0, window_bounds = array<i64: 8, 32>}, {pipeline_mode = #tpu.pipeline_mode<synchronous>, transform_indices = @transform_1, window_bounds = array<i64: 6, 128, 128>}, {pipeline_mode = #tpu.pipeline_mode<synchronous>, transform_indices = @transform_2, window_bounds = array<i64: 8, 128>}, {transform_indices = @transform_3, window_bounds = array<i64: 8, 8>}]} {
    %c0 = arith.constant 0 : index
    %c0_0 = arith.constant 0 : index
    %0 = vector.load %arg1[%c0, %c0_0] : memref<8x32xf32, #tpu.memory_space<vmem>>, vector<8x32xf32>
    %c0_1 = arith.constant 0 : index
    %c0_2 = arith.constant 0 : index
    %c0_3 = arith.constant 0 : index
    %1 = vector.load %arg2[%c0_1, %c0_2, %c0_3] : memref<6x128x128xf32, #tpu.memory_space<vmem>>, vector<1x32x128xf32>
    %2 = vector.shape_cast %1 : vector<1x32x128xf32> to vector<32x128xf32>
    %cst = arith.constant dense<0.000000e+00> : vector<8x128xf32>
    %3 = tpu.matmul %0, %2, %cst {dimension_numbers = #tpu.dot_dimension_numbers<[1], [0], [0], [1], [0, 0, 1, 1], [], []>} : vector<8x32xf32>, vector<32x128xf32>, vector<8x128xf32> -> vector<8x128xf32>
    %c0_4 = arith.constant 0 : index
    %c0_5 = arith.constant 0 : index
    %4 = vector.load %arg3[%c0_4, %c0_5] : memref<8x128xf32, #tpu.memory_space<vmem>>, vector<1x128xf32>
    %5 = vector.broadcast %4 : vector<1x128xf32> to vector<8x128xf32>
    %6 = arith.addf %3, %5 : vector<8x128xf32>
    %cst_6 = arith.constant 0.000000e+00 : f32
    %7 = vector.broadcast %cst_6 : f32 to vector<8x128xf32>
    %8 = arith.maximumf %6, %7 : vector<8x128xf32>
    %c1 = arith.constant 1 : index
    %c0_7 = arith.constant 0 : index
    %c0_8 = arith.constant 0 : index
    %9 = vector.load %arg2[%c1, %c0_7, %c0_8] : memref<6x128x128xf32, #tpu.memory_space<vmem>>, vector<1x128x128xf32>
    %10 = vector.shape_cast %9 : vector<1x128x128xf32> to vector<128x128xf32>
    %cst_9 = arith.constant dense<0.000000e+00> : vector<8x128xf32>
    %11 = tpu.matmul %8, %10, %cst_9 {dimension_numbers = #tpu.dot_dimension_numbers<[1], [0], [0], [1], [0, 0, 1, 1], [], []>} : vector<8x128xf32>, vector<128x128xf32>, vector<8x128xf32> -> vector<8x128xf32>
    %c1_10 = arith.constant 1 : index
    %c0_11 = arith.constant 0 : index
    %12 = vector.load %arg3[%c1_10, %c0_11] : memref<8x128xf32, #tpu.memory_space<vmem>>, vector<1x128xf32>
    %13 = vector.broadcast %12 : vector<1x128xf32> to vector<8x128xf32>
    %14 = arith.addf %11, %13 : vector<8x128xf32>
    %cst_12 = arith.constant 0.000000e+00 : f32
    %15 = vector.broadcast %cst_12 : f32 to vector<8x128xf32>
    %16 = arith.maximumf %14, %15 : vector<8x128xf32>
    %c2 = arith.constant 2 : index
    %c0_13 = arith.constant 0 : index
    %c0_14 = arith.constant 0 : index
    %17 = vector.load %arg2[%c2, %c0_13, %c0_14] : memref<6x128x128xf32, #tpu.memory_space<vmem>>, vector<1x128x128xf32>
    %18 = vector.shape_cast %17 : vector<1x128x128xf32> to vector<128x128xf32>
    %cst_15 = arith.constant dense<0.000000e+00> : vector<8x128xf32>
    %19 = tpu.matmul %16, %18, %cst_15 {dimension_numbers = #tpu.dot_dimension_numbers<[1], [0], [0], [1], [0, 0, 1, 1], [], []>} : vector<8x128xf32>, vector<128x128xf32>, vector<8x128xf32> -> vector<8x128xf32>
    %c2_16 = arith.constant 2 : index
    %c0_17 = arith.constant 0 : index
    %20 = vector.load %arg3[%c2_16, %c0_17] : memref<8x128xf32, #tpu.memory_space<vmem>>, vector<1x128xf32>
    %21 = vector.broadcast %20 : vector<1x128xf32> to vector<8x128xf32>
    %22 = arith.addf %19, %21 : vector<8x128xf32>
    %cst_18 = arith.constant 0.000000e+00 : f32
    %23 = vector.broadcast %cst_18 : f32 to vector<8x128xf32>
    %24 = arith.maximumf %22, %23 : vector<8x128xf32>
    %c3 = arith.constant 3 : index
    %c0_19 = arith.constant 0 : index
    %c0_20 = arith.constant 0 : index
    %25 = vector.load %arg2[%c3, %c0_19, %c0_20] : memref<6x128x128xf32, #tpu.memory_space<vmem>>, vector<1x128x128xf32>
    %26 = vector.shape_cast %25 : vector<1x128x128xf32> to vector<128x128xf32>
    %cst_21 = arith.constant dense<0.000000e+00> : vector<8x128xf32>
    %27 = tpu.matmul %24, %26, %cst_21 {dimension_numbers = #tpu.dot_dimension_numbers<[1], [0], [0], [1], [0, 0, 1, 1], [], []>} : vector<8x128xf32>, vector<128x128xf32>, vector<8x128xf32> -> vector<8x128xf32>
    %c3_22 = arith.constant 3 : index
    %c0_23 = arith.constant 0 : index
    %28 = vector.load %arg3[%c3_22, %c0_23] : memref<8x128xf32, #tpu.memory_space<vmem>>, vector<1x128xf32>
    %29 = vector.broadcast %28 : vector<1x128xf32> to vector<8x128xf32>
    %30 = arith.addf %27, %29 : vector<8x128xf32>
    %cst_24 = arith.constant 0.000000e+00 : f32
    %31 = vector.broadcast %cst_24 : f32 to vector<8x128xf32>
    %32 = arith.maximumf %30, %31 : vector<8x128xf32>
    %c4 = arith.constant 4 : index
    %c0_25 = arith.constant 0 : index
    %c0_26 = arith.constant 0 : index
    %33 = vector.load %arg2[%c4, %c0_25, %c0_26] : memref<6x128x128xf32, #tpu.memory_space<vmem>>, vector<1x128x128xf32>
    %34 = vector.shape_cast %33 : vector<1x128x128xf32> to vector<128x128xf32>
    %cst_27 = arith.constant dense<0.000000e+00> : vector<8x128xf32>
    %35 = tpu.matmul %32, %34, %cst_27 {dimension_numbers = #tpu.dot_dimension_numbers<[1], [0], [0], [1], [0, 0, 1, 1], [], []>} : vector<8x128xf32>, vector<128x128xf32>, vector<8x128xf32> -> vector<8x128xf32>
    %c4_28 = arith.constant 4 : index
    %c0_29 = arith.constant 0 : index
    %36 = vector.load %arg3[%c4_28, %c0_29] : memref<8x128xf32, #tpu.memory_space<vmem>>, vector<1x128xf32>
    %37 = vector.broadcast %36 : vector<1x128xf32> to vector<8x128xf32>
    %38 = arith.addf %35, %37 : vector<8x128xf32>
    %cst_30 = arith.constant 0.000000e+00 : f32
    %39 = vector.broadcast %cst_30 : f32 to vector<8x128xf32>
    %40 = arith.maximumf %38, %39 : vector<8x128xf32>
    %c5 = arith.constant 5 : index
    %c0_31 = arith.constant 0 : index
    %c0_32 = arith.constant 0 : index
    %41 = vector.load %arg2[%c5, %c0_31, %c0_32] : memref<6x128x128xf32, #tpu.memory_space<vmem>>, vector<1x128x128xf32>
    %42 = vector.shape_cast %41 : vector<1x128x128xf32> to vector<128x128xf32>
    %cst_33 = arith.constant dense<0.000000e+00> : vector<8x128xf32>
    %43 = tpu.matmul %40, %42, %cst_33 {dimension_numbers = #tpu.dot_dimension_numbers<[1], [0], [0], [1], [0, 0, 1, 1], [], []>} : vector<8x128xf32>, vector<128x128xf32>, vector<8x128xf32> -> vector<8x128xf32>
    %c5_34 = arith.constant 5 : index
    %c0_35 = arith.constant 0 : index
    %44 = vector.load %arg3[%c5_34, %c0_35] : memref<8x128xf32, #tpu.memory_space<vmem>>, vector<1x128xf32>
    %45 = vector.broadcast %44 : vector<1x128xf32> to vector<8x128xf32>
    %46 = arith.addf %43, %45 : vector<8x128xf32>
    %47 = vector.extract_strided_slice %46 {offsets = [0, 0], sizes = [8, 8], strides = [1, 1]} : vector<8x128xf32> to vector<8x8xf32>
    %c0_36 = arith.constant 0 : index
    %c0_37 = arith.constant 0 : index
    %48 = vector.load %arg4[%c0_36, %c0_37] : memref<8x8xf32, #tpu.memory_space<vmem>>, vector<8x8xf32>
    tpu.vector_store %arg4[%c0_36, %c0_37], %47 {strides = array<i32>} : memref<8x8xf32, #tpu.memory_space<vmem>>, vector<8x8xf32>,
    return
  }
  func.func @transform_0(%arg0: i32) -> (i32, i32) {
    %c0_i32 = arith.constant 0 : i32
    %c0_i32_0 = arith.constant 0 : i32
    return %arg0, %c0_i32 : i32, i32
  }
  func.func @transform_1(%arg0: i32) -> (i32, i32, i32) {
    %c0_i32 = arith.constant 0 : i32
    %c0_i32_0 = arith.constant 0 : i32
    %c0_i32_1 = arith.constant 0 : i32
    %c0_i32_2 = arith.constant 0 : i32
    return %c0_i32, %c0_i32_0, %c0_i32_1 : i32, i32, i32
  }
  func.func @transform_2(%arg0: i32) -> (i32, i32) {
    %c0_i32 = arith.constant 0 : i32
    %c0_i32_0 = arith.constant 0 : i32
    %c0_i32_1 = arith.constant 0 : i32
    return %c0_i32, %c0_i32_0 : i32, i32
  }
  func.func @transform_3(%arg0: i32) -> (i32, i32) {
    %c0_i32 = arith.constant 0 : i32
    %c0_i32_0 = arith.constant 0 : i32
    return %arg0, %c0_i32 : i32, i32
  }
}

</mosaic_0001>

<bundles_post_ra>
// kernel: tpu_custom_call.1
= control target key start
LH: loop header
LB: loop body
LE: loop exit
PB: predicated region body
PF: predicated region fallthrough
CT: control target
= control target key end

     0   :  { %8 = vsyncpa [#allocation3], 0  ;;  %s1721_s0 = inlined_call_operand.hbm [shape: f32[16,32], index: 0, kind: input, shape index: {}]   ;;  %s1722_s1 = inlined_call_operand.hbm [shape: f32[6,128,128], index: 1, kind: input, shape index: {}]   ;;  %s1723_s2 = inlined_call_operand.hbm [shape: f32[8,128], index: 2, kind: input, shape index: {}]   ;;  %s1724_s3 = inlined_call_operand.vmem [shape: f32[16,8], index: 3, kind: output, shape index: {}]  }
   0x1   :  { %10 = vsyncpa [#allocation3 + $0x1], 0 }
   0x2   :  { %11 = vsyncpa [#allocation5], 0  ;;  %s1490_s12 = smov 0   ;;  %s1492_s13 = smov 0  }
   0x3   :  { %s1494_s14 = smov 0   ;;  %s1496_s15 = smov 0  }
   0x4 LB: > { %s1509_s16 = sadd.s32 4294967295, %s1460_s15   ;;  %p37_p0 = scmp.ne.s32.totalorder %s1452_s13, %s1448_s12  ;;  %s1460_s15 = sphi %s1496_s15, %s1739_s15   ;;  %s1456_s14 = sphi %s1494_s14, %s1738_s14   ;;  %s1452_s13 = sphi %s1492_s13, %s1737_s13   ;;  %s1448_s12 = sphi %s1490_s12, %s1736_s12  }
   0x5   : > { %p1725_p1 = scmp.eq.s32.totalorder %s1509_s16, 0  ;;  %p849_p2 = scmp.ge.s32.totalorder %s1460_s15, 1 }
   0x6   : > { %p116_p3 = scmp.lt.s32.totalorder %s1460_s15, 3  ;;  %s1462_s19 = smov [#allocation4]  }
   0x7   : > { %p1517_p4 = por %p1725_p1, %p37_p0  ;;  %s128_s20 = sshll.u32 %s1462_s19, 4  ;;  %s129_s20 = int_to_ptr.vmem [resolvable:$true] %s128_s20 }
   0x8   : > { %p1521_p5 = pnand %p849_p2, %p116_p3  ;;  %s1463_s22 = smov [#allocation6]  }
   0x9   : > { %s1728_s17 = scalar_select %p1517_p4, 1, 0 }
   0xa   : > { %s1729_s18 = scalar_select %p1521_p5, 1, 0 }
   0xb   : > { %p1281_p6 = pneg %p1521_p5  ;;  %s142_s23 = sshll.u32 %s1463_s22, 4  ;;  %s1533_s23 = int_to_ptr.vmem [resolvable:$true] %s142_s23 }
   0xc   : > { %s1336_s26 = scalar_lea.hbm %s1722_s1, 12288 }
   0xd   : > { %p1529_p7 = pnand %p1281_p6, %p1725_p1  ;;  %p1337_p8 = scmp.ne.s32.totalorder %s1722_s1, %s1336_s26 }
   0xe   : > { %p1343_p12 = scmp.lt.u32.totalorder %s1336_s26, %s1722_s1 }
   0xf   : > { %p1338_p9 = pneg %p1529_p7 }
  0x11   : > { %p1339_p10 = pnand %p1338_p9, %p1337_p8 }
  0x13   : > { %p1340_p11 = pneg %p1339_p10 }
  0x15   : > { %p1345_p13 = pnand %p1343_p12, %p1340_p11 }
  0x17   : > { %1348 = shalt.err (!%p1345_p13)
}
  0x18   : > { %s1349_s4 = scalar_lea.vmem %s129_s20, 12288  ;;  %p1357_p6 = scmp.lt.s32.totalorder %s129_s20, %s129_s20 }
  0x19   : > { %p1350_p0 = scmp.ne.s32.totalorder %s129_s20, %s1349_s4  ;;  %p1358_p1 = scmp.lt.s32.totalorder %s1349_s4, %s1349_s4 }
  0x1b   : > { %p1352_p2 = pnand %p1350_p0, %p1338_p9  ;;  %p1359_p4 = por %p1358_p1, %p1357_p6 }
  0x1d   : > { %p1353_p3 = pneg %p1352_p2 }
  0x1f   : > { %p1360_p5 = pnand %p1359_p4, %p1353_p3 }
  0x21   : > { %1363 = shalt.err (!%p1360_p5)
}
  0x22   : > { %s1464_s5 = smov 128   ;;  %s1465_s6 = smov 8  }
  0x23   : > { %1284 = dma.hbm_to_vmem [thread:$0]  (!%p1529_p7), %s1722_s1, 12288, %s129_s20, [#allocation5], %s1464_s5, %s1464_s5, %s1465_s6  }
  0x24   : > { %s1364_s11 = scalar_lea.hbm %s1723_s2, 128 }
  0x25   : > { %p1365_p8 = scmp.ne.s32.totalorder %s1723_s2, %s1364_s11  ;;  %p1371_p5 = scmp.lt.u32.totalorder %s1364_s11, %s1723_s2 }
  0x27   : > { %p1367_p1 = pnand %p1365_p8, %p1338_p9 }
  0x29   : > { %p1368_p4 = pneg %p1367_p1 }
  0x2b   : > { %p1373_p10 = pnand %p1371_p5, %p1368_p4 }
  0x2d   : > { %1376 = shalt.err (!%p1373_p10)
}
  0x2e   : > { %s1377_s20 = scalar_lea.vmem %s1533_s23, 128  ;;  %p1385_p0 = scmp.lt.s32.totalorder %s1533_s23, %s1533_s23 }
  0x2f   : > { %p1378_p11 = scmp.ne.s32.totalorder %s1533_s23, %s1377_s20  ;;  %p1386_p2 = scmp.lt.s32.totalorder %s1377_s20, %s1377_s20 }
  0x31   : > { %p1380_p12 = pnand %p1378_p11, %p1338_p9  ;;  %p1387_p3 = por %p1386_p2, %p1385_p0 }
  0x33   : > { %p1381_p13 = pneg %p1380_p12 }
  0x35   : > { %p1388_p6 = pnand %p1387_p3, %p1381_p13 }
  0x37   : > { %1391 = shalt.err (!%p1388_p6)
}
  0x38   : > { %1287 = dma.hbm_to_vmem [thread:$0]  (!%p1529_p7), %s1723_s2, 128, %s1533_s23, [#allocation5]  }
  0x39   : > { %s1583_s27 = sadd.s32 1, %s1460_s15   ;;  %s24_s28 = sadd.s32 1, %s1456_s14 }
  0x3a   : > { %s21_s21 = ssub.s32 %s1460_s15, %s1583_s27  ;;  %p31_p9 = scmp.ne.s32.totalorder %s1456_s14, %s1452_s13 }
  0x3b   : > { %p22_p8 = scmp.eq.s32.totalorder %s21_s21, 0  ;;  %p32_p1 = scmp.eq.s32.totalorder %s1460_s15, 0 }
  0x3c   : > { %p1294_p4 = scmp.lt.s32.totalorder %s1460_s15, 2  ;;  %s153_s29 = sand.u32 1, %s1456_s14  }
  0x3d   : > { %s1594_s30 = scalar_select %p22_p8, %s1456_s14, %s24_s28  }
  0x3e   : > { %p33_p5 = por %p32_p1, %p31_p9  ;;  %s853_s4 = sshll.u32 %s153_s29, 3 }
  0x3f   : > { %s854_s5 = sshll.u32 %s1460_s15, 7  ;;  %s157_s23 = scalar_lea.vmem [#allocation2], %s853_s4 }
  0x40   : > { %s1600_s8 = scalar_lea.hbm %s1721_s0, %s854_s5  ;;  %s164_s9 = sshll.u32 %s157_s23, 4  ;;  %s1606_s9 = int_to_ptr.vmem [resolvable:$true] %s164_s9 }
  0x41   : > { %p1602_p7 = pnand %p1294_p4, %p33_p5  ;;  %s154_s15 = scalar_lea.sflag [#allocation3], %s153_s29 }
  0x42   : > { %s1392_s11 = scalar_lea.hbm %s1600_s8, 128  ;;  %s1397_s22 = scalar_lea.hbm %s1721_s0, 256 }
  0x43   : > { %p1393_p10 = scmp.ne.s32.totalorder %s1600_s8, %s1392_s11  ;;  %p1394_p11 = pneg %p1602_p7 }
  0x44   : > { %p1398_p0 = scmp.lt.u32.totalorder %s1600_s8, %s1721_s0  ;;  %p1399_p2 = scmp.lt.u32.totalorder %s1397_s22, %s1392_s11 }
  0x45   : > { %p1395_p12 = pnand %p1394_p11, %p1393_p10  ;;  %p1401_p6 = scmp.lt.u32.totalorder %s1392_s11, %s1600_s8 }
  0x46   : > { %p1400_p3 = por %p1399_p2, %p1398_p0 }
  0x47   : > { %p1396_p13 = pneg %p1395_p12 }
  0x48   : > { %p1402_p9 = por %p1401_p6, %p1400_p3 }
  0x4a   : > { %p1403_p8 = pnand %p1402_p9, %p1396_p13 }
  0x4c   : > { %1406 = shalt.err (!%p1403_p8)
}
  0x4d   : > { %s1407_s25 = scalar_lea.vmem %s1606_s9, 128  ;;  %s1466_s26 = smov [#allocation2]  }
  0x4e   : > { %p1408_p1 = scmp.ne.s32.totalorder %s1606_s9, %s1407_s25  ;;  %s1412_s28 = sshll.u32 %s1466_s26, 4  ;;  %s1413_s28 = int_to_ptr.vmem [resolvable:$false] %s1412_s28 }
  0x4f   : > { %s1414_s21 = scalar_lea.vmem %s1413_s28, 256  ;;  %p1415_p10 = scmp.lt.s32.totalorder %s1606_s9, %s1413_s28 }
  0x50   : > { %p1410_p4 = pnand %p1408_p1, %p1394_p11  ;;  %p1416_p12 = scmp.lt.s32.totalorder %s1414_s21, %s1407_s25 }
  0x52   : > { %p1411_p5 = pneg %p1410_p4  ;;  %p1417_p0 = por %p1416_p12, %p1415_p10 }
  0x54   : > { %p1418_p2 = pnand %p1417_p0, %p1411_p5 }
  0x56   : > { %1421 = shalt.err (!%p1418_p2)
}
  0x57   : > { %1291 = dma.hbm_to_vmem [thread:$0]  (!%p1602_p7), %s1600_s8, 128, %s1606_s9, %s154_s15  }
  0x58   : > { %p1732_p13 = scmp.ne.s32.totalorder %s1729_s18, 0 }
  0x59   : > { %s175_s29 = sand.u32 (!%p1732_p13), 1, %s1452_s13   ;;  %p1733_p11 = scmp.ne.s32.totalorder (!%p1732_p13), %s1728_s17, 0 }
  0x5a   : > { %173 = sbr.rel (%p1732_p13) target bundleno = 1406 (0x57e), region = 32  ;;  %s1636_s4 = sshll.u32 (!%p1732_p13), %s175_s29, 3 }
  0x5b   : > { %s176_s5 = scalar_lea.sflag (!%p1732_p13), [#allocation3], %s175_s29  ;;  %s179_s6 = scalar_lea.vmem (!%p1732_p13), [#allocation2], %s1636_s4 }
  0x61   : > { %1439 = dma.done.wait (%p1733_p11), %s176_s5, 128  }
  0x62   : > { %1441 = vsyncadd (%p1733_p11), %s176_s5, 4294967168  ;;  %p1734_p3 = scmp.eq.s32.totalorder %s1509_s16, 0 }
  0x64   : > { %1443 = dma.done.wait (%p1734_p3), [#allocation5], 12416   ;;  %p1735_p7 = pmov %p1734_p3 }
  0x65   : > { %v1467_v0 = vmov 0.0|0.0   ;;  %vm1468_vm0 = vmmov 0   ;;  %v1469_v1 = vmov 0.0   ;;  %v214_v2 = vld [vmem:[#allocation4] sm:$0xff]  ;;  %v215_v3 = vld [vmem:[#allocation4 + $0x8] sm:$0xff]  ;;  %v216_v4 = vld [vmem:[#allocation4 + $0x10] sm:$0xff] }
  0x66   : > { %1445 = vsyncadd (%p1735_p7), [#allocation5], 4294954880  ;;  %1145 = vmatprep.subr.bf16.mxu0 %v1467_v0  ;;  %967 = vmatprep.mubr.msk.f32.mxu0 %vm1468_vm0, %v1469_v1  ;;  %v1146_v5 = vpack.c.bf16 %v215_v3, %v214_v2  ;;  %v217_v6 = vld [vmem:[#allocation4 + $0x18] sm:$0xff]  ;;  %v299_v7 = vld [vmem:[#allocation4 + $0x80] sm:$0xff]  ;;  %vm223_vm1 = vcmask 261120   ;;  %p209_p6 = scmp.lt.s32.totalorder %s1509_s16, 1 }
  0x67   : > { %1151 = vmatprep.subr.bf16.mxu1 %v1467_v0  ;;  %1002 = vmatprep.mubr.msk.f32.mxu1 %vm1468_vm0, %v1469_v1  ;;  %v300_v8 = vld [vmem:[#allocation4 + $0x88] sm:$0xff]  ;;  %v301_v9 = vld [vmem:[#allocation4 + $0x90] sm:$0xff]  ;;  %v302_v10 = vld [vmem:[#allocation4 + $0x98] sm:$0xff]  ;;  %v1149_v11 = vpack.c.bf16 %v217_v6, %v216_v4  ;;  %vm762_vm2 = vcmask 64512  }
  0x68   : > { %1147 = vmatpush3.bf16.msra.mxu0 %v1146_v5  ;;  %v1152_v12 = vpack.c.bf16 %v300_v8, %v299_v7  ;;  %v1155_v13 = vpack.c.bf16 %v302_v10, %v301_v9  ;;  %v303_v14 = vld [vmem:[#allocation4 + $0xa0] sm:$0xff]  ;;  %v304_v15 = vld [vmem:[#allocation4 + $0xa8] sm:$0xff]  ;;  %v213_v16 = vld [vmem:[%s179_s6] sm:$0xff]  ;;  %s1741_s16 = smov (!%p209_p6, %s1509_s16), 1 }
  0x69   : > { %1148 = vmatprep.subr.bf16.mxu0 %v1467_v0  ;;  %v1158_v17 = vpack.c.bf16 %v304_v15, %v303_v14  ;;  %v305_v18 = vld [vmem:[#allocation4 + $0xb0] sm:$0xff]  ;;  %v306_v19 = vld [vmem:[#allocation4 + $0xb8] sm:$0xff]  ;;  %v307_v21 = vld [vmem:[#allocation4 + $0xc0] sm:$0xff]  ;;  %s859_s17 = sshll.u32 %s1741_s16, 3 }
  0x6a   : > { %1153 = vmatpush3.bf16.msra.mxu1 %v1152_v12  ;;  %v1161_v20 = vpack.c.bf16 %v306_v19, %v305_v18  ;;  %v308_v22 = vld [vmem:[#allocation4 + $0xc8] sm:$0xff]  ;;  %v309_v24 = vld [vmem:[#allocation4 + $0xd0] sm:$0xff]  ;;  %v310_v25 = vld [vmem:[#allocation4 + $0xd8] sm:$0xff]  ;;  %s212_s8 = scalar_lea.vmem %s1724_s3, %s859_s17 }
  0x6b   : > { %1154 = vmatprep.subr.bf16.mxu1 %v1467_v0  ;;  %v1164_v23 = vpack.c.bf16 %v308_v22, %v307_v21  ;;  %v1167_v26 = vpack.c.bf16 %v310_v25, %v309_v24  ;;  %v311_v27 = vld [vmem:[#allocation4 + $0xe0] sm:$0xff]  ;;  %v312_v28 = vld [vmem:[#allocation4 + $0xe8] sm:$0xff]  ;;  %v313_v30 = vld [vmem:[#allocation4 + $0xf0] sm:$0xff] }
  0x6c   : > { %1150 = vmatpush3.bf16.msra.mxu0 %v1149_v11  ;;  %v1170_v29 = vpack.c.bf16 %v312_v28, %v311_v27  ;;  %v314_v31 = vld [vmem:[#allocation4 + $0xf8] sm:$0xff]  ;;  %v392_v33 = vld [vmem:[#allocation4 + $0x100] sm:$0xff]  ;;  %v393_v34 = vld [vmem:[#allocation4 + $0x108] sm:$0xff] }
  0x6d   : > { %1175 = vmatprep.subr.bf16.mxu0 %v1467_v0  ;;  %v1173_v32 = vpack.c.bf16 %v314_v31, %v313_v30  ;;  %v394_v35 = vld [vmem:[#allocation4 + $0x110] sm:$0xff]  ;;  %v1176_v36 = vpack.c.bf16 %v393_v34, %v392_v33  ;;  %v395_v37 = vld [vmem:[#allocation4 + $0x118] sm:$0xff]  ;;  %v396_v39 = vld [vmem:[#allocation4 + $0x120] sm:$0xff] }
  0x6e   : > { %1156 = vmatpush3.bf16.msra.mxu1 %v1155_v13  ;;  %v1179_v38 = vpack.c.bf16 %v395_v37, %v394_v35  ;;  %v397_v40 = vld [vmem:[#allocation4 + $0x128] sm:$0xff]  ;;  %v398_v42 = vld [vmem:[#allocation4 + $0x130] sm:$0xff]  ;;  %v399_v43 = vld [vmem:[#allocation4 + $0x138] sm:$0xff] }
  0x6f   : > { %968 = vmatmul.mubr.msk.f32.vlgmr.msra.gmra.mrb[0].mxu0 %vm223_vm1, %v213_v16  ;;  %1157 = vmatprep.subr.bf16.mxu1 %v1467_v0  ;;  %v1182_v41 = vpack.c.bf16 %v397_v40, %v396_v39  ;;  %v1185_v44 = vpack.c.bf16 %v399_v43, %v398_v42  ;;  %v400_v45 = vld [vmem:[#allocation4 + $0x140] sm:$0xff]  ;;  %v401_v46 = vld [vmem:[#allocation4 + $0x148] sm:$0xff]  ;;  %v402_v48 = vld [vmem:[#allocation4 + $0x150] sm:$0xff] }
  0x70   : > { %1037 = vmatprep.mubr.msk.f32.mxu0 %vm1468_vm0, %v1469_v1  ;;  %1177 = vmatpush3.bf16.msra.mxu0 %v1176_v36  ;;  %v1188_v47 = vpack.c.bf16 %v401_v46, %v400_v45  ;;  %v403_v49 = vld [vmem:[#allocation4 + $0x158] sm:$0xff]  ;;  %v404_v51 = vld [vmem:[#allocation4 + $0x160] sm:$0xff]  ;;  %v405_v52 = vld [vmem:[#allocation4 + $0x168] sm:$0xff] }
  0x71   : > { %1178 = vmatprep.subr.bf16.mxu0 %v1467_v0  ;;  %v1191_v50 = vpack.c.bf16 %v403_v49, %v402_v48  ;;  %v1194_v53 = vpack.c.bf16 %v405_v52, %v404_v51  ;;  %v860_v54 = vld [vmem:[#allocation6] ss:$0 sm:$0xff]  ;;  %v406_v59 = vld [vmem:[#allocation4 + $0x170] sm:$0xff]  ;;  %v407_v60 = vld [vmem:[#allocation4 + $0x178] sm:$0xff] }
  0x72   : > { %1159 = vmatpush3.bf16.msra.mxu1 %v1158_v17  ;;  %v1197_v61 = vpack.c.bf16 %v407_v60, %v406_v59  ;;  %v485_v62 = vld [vmem:[#allocation4 + $0x180] sm:$0xff]  ;;  %v486_v63 = vld [vmem:[#allocation4 + $0x188] sm:$0xff]  ;;  %v487_v2 = vld [vmem:[#allocation4 + $0x190] sm:$0xff] }
  0x73   : > { %1160 = vmatprep.subr.bf16.mxu1 %v1467_v0  ;;  %v1200_v3 = vpack.c.bf16 %v486_v63, %v485_v62  ;;  %v488_v4 = vld [vmem:[#allocation4 + $0x198] sm:$0xff]  ;;  %v489_v6 = vld [vmem:[#allocation4 + $0x1a0] sm:$0xff]  ;;  %v490_v7 = vld [vmem:[#allocation4 + $0x1a8] sm:$0xff] }
  0x74   : > { %1180 = vmatpush3.bf16.msra.mxu0 %v1179_v38  ;;  %v1203_v5 = vpack.c.bf16 %v488_v4, %v487_v2  ;;  %v1206_v8 = vpack.c.bf16 %v490_v7, %v489_v6  ;;  %v491_v9 = vld [vmem:[#allocation4 + $0x1b0] sm:$0xff]  ;;  %v492_v10 = vld [vmem:[#allocation4 + $0x1b8] sm:$0xff]  ;;  %v493_v12 = vld [vmem:[#allocation4 + $0x1c0] sm:$0xff] }
  0x75   : > { %1181 = vmatprep.subr.bf16.mxu0 %v1467_v0  ;;  %v1209_v11 = vpack.c.bf16 %v492_v10, %v491_v9  ;;  %v494_v13 = vld [vmem:[#allocation4 + $0x1c8] sm:$0xff]  ;;  %v495_v15 = vld [vmem:[#allocation4 + $0x1d0] sm:$0xff]  ;;  %v496_v16 = vld [vmem:[#allocation4 + $0x1d8] sm:$0xff] }
  0x76   : > { %1162 = vmatpush3.bf16.msra.mxu1 %v1161_v20  ;;  %v1212_v14 = vpack.c.bf16 %v494_v13, %v493_v12  ;;  %v1215_v17 = vpack.c.bf16 %v496_v16, %v495_v15  ;;  %v497_v18 = vld [vmem:[#allocation4 + $0x1e0] sm:$0xff]  ;;  %v498_v19 = vld [vmem:[#allocation4 + $0x1e8] sm:$0xff]  ;;  %v500_v27 = vld [vmem:[#allocation4 + $0x1f8] sm:$0xff] }
  0x77   : > { %1163 = vmatprep.subr.bf16.mxu1 %v1467_v0  ;;  %v1218_v20 = vpack.c.bf16 %v498_v19, %v497_v18  ;;  %v862_v21 = vld [vmem:[#allocation6 + $0x1] ss:$0 sm:$0xff]  ;;  %v579_v30 = vld [vmem:[#allocation4 + $0x208] sm:$0xff]  ;;  %v580_v31 = vld [vmem:[#allocation4 + $0x210] sm:$0xff] }
  0x78   : > { %1183 = vmatpush3.bf16.msra.mxu0 %v1182_v41  ;;  %v581_v33 = vld [vmem:[#allocation4 + $0x218] sm:$0xff]  ;;  %v582_v35 = vld [vmem:[#allocation4 + $0x220] sm:$0xff]  ;;  %v583_v36 = vld [vmem:[#allocation4 + $0x228] sm:$0xff] }
  0x79   : > { %1184 = vmatprep.subr.bf16.mxu0 %v1467_v0  ;;  %v1227_v34 = vpack.c.bf16 %v581_v33, %v580_v31  ;;  %v1230_v37 = vpack.c.bf16 %v583_v36, %v582_v35  ;;  %v584_v38 = vld [vmem:[#allocation4 + $0x230] sm:$0xff]  ;;  %v585_v39 = vld [vmem:[#allocation4 + $0x238] sm:$0xff]  ;;  %v586_v41 = vld [vmem:[#allocation4 + $0x240] sm:$0xff] }
  0x7a   : > { %1165 = vmatpush3.bf16.msra.mxu1 %v1164_v23  ;;  %v1233_v40 = vpack.c.bf16 %v585_v39, %v584_v38  ;;  %v587_v42 = vld [vmem:[#allocation4 + $0x248] sm:$0xff]  ;;  %v589_v45 = vld [vmem:[#allocation4 + $0x258] sm:$0xff]  ;;  %v673_v60 = vld [vmem:[#allocation4 + $0x290] sm:$0xff] }
  0x7b   : > { %1166 = vmatprep.subr.bf16.mxu1 %v1467_v0  ;;  %v1236_v43 = vpack.c.bf16 %v587_v42, %v586_v41  ;;  %v591_v48 = vld [vmem:[#allocation4 + $0x268] sm:$0xff]  ;;  %v674_v62 = vld [vmem:[#allocation4 + $0x298] sm:$0xff]  ;;  %v675_v2 = vld [vmem:[#allocation4 + $0x2a0] sm:$0xff] }
  0x7c   : > { %1186 = vmatpush3.bf16.msra.mxu0 %v1185_v44  ;;  %v588_v44 = vld [vmem:[#allocation4 + $0x250] sm:$0xff]  ;;  %v672_v59 = vld [vmem:[#allocation4 + $0x288] sm:$0xff]  ;;  %v1251_v63 = vpack.c.bf16 %v674_v62, %v673_v60  ;;  %v679_v7 = vld [vmem:[#allocation4 + $0x2c0] sm:$0xff] }
  0x7d   : > { %1187 = vmatprep.subr.bf16.mxu0 %v1467_v0  ;;  %v1239_v46 = vpack.c.bf16 %v589_v45, %v588_v44  ;;  %v681_v10 = vld [vmem:[#allocation4 + $0x2d0] sm:$0xff]  ;;  %v683_v13 = vld [vmem:[#allocation4 + $0x2e0] sm:$0xff] }
  0x7e   : > { %1168 = vmatpush3.bf16.msra.mxu1 %v1167_v26  ;;  %v499_v26 = vld [vmem:[#allocation4 + $0x1f0] sm:$0xff]  ;;  %v864_v16 = vld [vmem:[#allocation6 + $0x3] ss:$0 sm:$0xff] }
  0x7f   : > { %1169 = vmatprep.subr.bf16.mxu1 %v1467_v0  ;;  %v1221_v28 = vpack.c.bf16 %v500_v27, %v499_v26 }
  0x80   : > { %1189 = vmatpush3.bf16.msra.mxu0 %v1188_v47  ;;  %v590_v47 = vld [vmem:[#allocation4 + $0x260] sm:$0xff] }
  0x81   : > { %1190 = vmatprep.subr.bf16.mxu0 %v1467_v0  ;;  %v1242_v49 = vpack.c.bf16 %v591_v48, %v590_v47 }
  0x82   : > { %1171 = vmatpush3.bf16.msra.mxu1 %v1170_v29  ;;  %v578_v29 = vld [vmem:[#allocation4 + $0x200] sm:$0xff] }
  0x83   : > { %1172 = vmatprep.subr.bf16.mxu1 %v1467_v0 }
  0x84   : > { %1192 = vmatpush3.bf16.msra.mxu0 %v1191_v50  ;;  %v863_v50 = vld [vmem:[#allocation6 + $0x2] ss:$0 sm:$0xff] }
  0x85   : > { %1193 = vmatprep.subr.bf16.mxu0 %v1467_v0 }
  0x86   : > { %1174 = vmatpush3.bf16.msra.mxu1 %v1173_v32  ;;  %v1224_v32 = vpack.c.bf16 %v579_v30, %v578_v29 }
  0x87   : > { %1199 = vmatprep.subr.bf16.mxu1 %v1467_v0 }
  0x88   : > { %1195 = vmatpush3.bf16.msra.mxu0 %v1194_v53 }
  0x89   : > { %1196 = vmatprep.subr.bf16.mxu0 %v1467_v0 }
  0x8c   : > { %1198 = vmatpush3.bf16.msra.mxu0 %v1197_v61 }
  0x8d   : > { %1223 = vmatprep.subr.bf16.mxu0 %v1467_v0 }
 0x142   : > { %v293_v55 = vpop.f32.mrb[0].mxu0 }
 0x143   : > { %v294_v56 = vadd.f32 %v860_v54, %v293_v55  ;;  %v969_v57 = vpop.f32.mrb[1].mxu0  ;;  %v592_v55 = vld [vmem:[#allocation4 + $0x270] sm:$0xff] }
 0x145   : > { %v297_v58 = vmax.f32 %v294_v56, 0.0  ;;  %v593_v56 = vld [vmem:[#allocation4 + $0x278] sm:$0xff] }
 0x146   : > { %v1245_v57 = vpack.c.bf16 %v593_v56, %v592_v55 }
 0x147   : > { %1003 = vmatmul.mubr.f32.vlgmr.msra.gmra.mrb[0].mxu1 %v297_v58  ;;  %v671_v58 = vld [vmem:[#allocation4 + $0x280] sm:$0xff] }
 0x148   : > { %1072 = vmatprep.mubr.msk.f32.mxu1 %vm1468_vm0, %v1469_v1  ;;  %1201 = vmatpush3.bf16.msra.mxu1 %v1200_v3  ;;  %v1248_v61 = vpack.c.bf16 %v672_v59, %v671_v58  ;;  %v676_v3 = vld [vmem:[#allocation4 + $0x2a8] sm:$0xff] }
 0x149   : > { %1202 = vmatprep.subr.bf16.mxu1 %v1467_v0  ;;  %v1254_v4 = vpack.c.bf16 %v676_v3, %v675_v2 }
 0x14c   : > { %1204 = vmatpush3.bf16.msra.mxu1 %v1203_v5  ;;  %v678_v5 = vld [vmem:[#allocation4 + $0x2b8] sm:$0xff] }
 0x14d   : > { %1205 = vmatprep.subr.bf16.mxu1 %v1467_v0 }
 0x150   : > { %1207 = vmatpush3.bf16.msra.mxu1 %v1206_v8  ;;  %v680_v8 = vld [vmem:[#allocation4 + $0x2c8] sm:$0xff] }
 0x151   : > { %1208 = vmatprep.subr.bf16.mxu1 %v1467_v0  ;;  %v1260_v9 = vpack.c.bf16 %v680_v8, %v679_v7 }
 0x154   : > { %1210 = vmatpush3.bf16.msra.mxu1 %v1209_v11  ;;  %v682_v11 = vld [vmem:[#allocation4 + $0x2d8] sm:$0xff] }
 0x155   : > { %1211 = vmatprep.subr.bf16.mxu1 %v1467_v0  ;;  %v1263_v12 = vpack.c.bf16 %v682_v11, %v681_v10 }
 0x158   : > { %1213 = vmatpush3.bf16.msra.mxu1 %v1212_v14  ;;  %v684_v14 = vld [vmem:[#allocation4 + $0x2e8] sm:$0xff] }
 0x159   : > { %1214 = vmatprep.subr.bf16.mxu1 %v1467_v0  ;;  %v1266_v15 = vpack.c.bf16 %v684_v14, %v683_v13 }
 0x15c   : > { %1216 = vmatpush3.bf16.msra.mxu1 %v1215_v17 }
 0x15d   : > { %1217 = vmatprep.subr.bf16.mxu1 %v1467_v0 }
 0x160   : > { %1219 = vmatpush3.bf16.msra.mxu1 %v1218_v20 }
 0x161   : > { %1220 = vmatprep.subr.bf16.mxu1 %v1467_v0 }
 0x164   : > { %1222 = vmatpush3.bf16.msra.mxu1 %v1221_v28 }
 0x165   : > { %1247 = vmatprep.subr.bf16.mxu1 %v1467_v0 }
 0x21a   : > { %v386_v22 = vpop.f32.mrb[0].mxu1 }
 0x21b   : > { %v387_v23 = vadd.f32 %v862_v21, %v386_v22  ;;  %v1004_v24 = vpop.f32.mrb[1].mxu1  ;;  %v685_v21 = vld [vmem:[#allocation4 + $0x2f0] sm:$0xff]  ;;  %v686_v22 = vld [vmem:[#allocation4 + $0x2f8] sm:$0xff] }
 0x21c   : > { %v865_v24 = vld [vmem:[#allocation6 + $0x4] ss:$0 sm:$0xff] }
 0x21d   : > { %v390_v25 = vmax.f32 %v387_v23, 0.0  ;;  %v1269_v23 = vpack.c.bf16 %v686_v22, %v685_v21 }
 0x21f   : > { %1038 = vmatmul.mubr.f32.vlgmr.msra.gmra.mrb[2].mxu0 %v390_v25 }
 0x220   : > { %1107 = vmatprep.mubr.msk.f32.mxu0 %vm1468_vm0, %v1469_v1  ;;  %1225 = vmatpush3.bf16.msra.mxu0 %v1224_v32 }
 0x221   : > { %1226 = vmatprep.subr.bf16.mxu0 %v1467_v0 }
 0x224   : > { %1228 = vmatpush3.bf16.msra.mxu0 %v1227_v34 }
 0x225   : > { %1229 = vmatprep.subr.bf16.mxu0 %v1467_v0 }
 0x228   : > { %1231 = vmatpush3.bf16.msra.mxu0 %v1230_v37 }
 0x229   : > { %1232 = vmatprep.subr.bf16.mxu0 %v1467_v0 }
 0x22c   : > { %1234 = vmatpush3.bf16.msra.mxu0 %v1233_v40 }
 0x22d   : > { %1235 = vmatprep.subr.bf16.mxu0 %v1467_v0 }
 0x230   : > { %1237 = vmatpush3.bf16.msra.mxu0 %v1236_v43 }
 0x231   : > { %1238 = vmatprep.subr.bf16.mxu0 %v1467_v0 }
 0x234   : > { %1240 = vmatpush3.bf16.msra.mxu0 %v1239_v46 }
 0x235   : > { %1241 = vmatprep.subr.bf16.mxu0 %v1467_v0 }
 0x238   : > { %1243 = vmatpush3.bf16.msra.mxu0 %v1242_v49 }
 0x239   : > { %1244 = vmatprep.subr.bf16.mxu0 %v1467_v0 }
 0x23c   : > { %1246 = vmatpush3.bf16.msra.mxu0 %v1245_v57 }
 0x2f2   : > { %v479_v51 = vpop.f32.mrb[2].mxu0 }
 0x2f3   : > { %v480_v52 = vadd.f32 %v863_v50, %v479_v51  ;;  %v1039_v53 = vpop.f32.mrb[3].mxu0 }
 0x2f5   : > { %v483_v54 = vmax.f32 %v480_v52, 0.0 }
 0x2f7   : > { %1073 = vmatmul.mubr.f32.vlgmr.msra.gmra.mrb[2].mxu1 %v483_v54 }
 0x2f8   : > { %1142 = vmatprep.mubr.msk.f32.mxu1 %vm1468_vm0, %v1469_v1  ;;  %1249 = vmatpush3.bf16.msra.mxu1 %v1248_v61  ;;  %v677_v1 = vld [vmem:[#allocation4 + $0x2b0] sm:$0xff] }
 0x2f9   : > { %1250 = vmatprep.subr.bf16.mxu1 %v1467_v0  ;;  %v1257_v6 = vpack.c.bf16 %v678_v5, %v677_v1 }
 0x2fc   : > { %1252 = vmatpush3.bf16.msra.mxu1 %v1251_v63 }
 0x2fd   : > { %1253 = vmatprep.subr.bf16.mxu1 %v1467_v0 }
 0x300   : > { %1255 = vmatpush3.bf16.msra.mxu1 %v1254_v4 }
 0x301   : > { %1256 = vmatprep.subr.bf16.mxu1 %v1467_v0 }
 0x304   : > { %1258 = vmatpush3.bf16.msra.mxu1 %v1257_v6 }
 0x305   : > { %1259 = vmatprep.subr.bf16.mxu1 %v1467_v0 }
 0x308   : > { %1261 = vmatpush3.bf16.msra.mxu1 %v1260_v9 }
 0x309   : > { %1262 = vmatprep.subr.bf16.mxu1 %v1467_v0 }
 0x30c   : > { %1264 = vmatpush3.bf16.msra.mxu1 %v1263_v12 }
 0x30d   : > { %1265 = vmatprep.subr.bf16.mxu1 %v1467_v0 }
 0x310   : > { %1267 = vmatpush3.bf16.msra.mxu1 %v1266_v15 }
 0x311   : > { %1268 = vmatprep.subr.bf16.mxu1 %v1467_v0  ;;  %v866_v0 = vld [vmem:[#allocation6 + $0x5] ss:$0 sm:$0xff] }
 0x314   : > { %1270 = vmatpush3.bf16.msra.mxu1 %v1269_v23 }
 0x3ca   : > { %v572_v17 = vpop.f32.mrb[2].mxu1 }
 0x3cb   : > { %v573_v18 = vadd.f32 %v864_v16, %v572_v17  ;;  %v1074_v19 = vpop.f32.mrb[3].mxu1 }
 0x3cd   : > { %v576_v20 = vmax.f32 %v573_v18, 0.0 }
 0x3cf   : > { %1108 = vmatmul.mubr.f32.vlgmr.msra.gmra.mrb[4].mxu0 %v576_v20 }
 0x4a2   : > { %v665_v25 = vpop.f32.mrb[4].mxu0 }
 0x4a3   : > { %v666_v26 = vadd.f32 %v865_v24, %v665_v25  ;;  %v1109_v27 = vpop.f32.mrb[5].mxu0 }
 0x4a5   : > { %v669_v28 = vmax.f32 %v666_v26, 0.0 }
 0x4a7   : > { %1143 = vmatmul.mubr.f32.vlgmr.msra.gmra.mrb[4].mxu1 %v669_v28 }
 0x57a   : > { %v758_v29 = vpop.f32.mrb[4].mxu1 }
 0x57b   : > { %v759_v30 = vadd.f32 %v866_v0, %v758_v29  ;;  %v1144_v31 = vpop.f32.mrb[5].mxu1 }
 0x57d   : > { %763 = vst.msk [vmem:[%s212_s8] sm:$0xff] %vm762_vm2, %v759_v30 }
 0x57e PF: > { %p14_p9 = scmp.ge.s32.totalorder %s1583_s27, 4   ;;  %s1736_s12 = smov %s1452_s13 }
 0x57f   : > { %s1737_s13 = smov %s1456_s14  ;;  %s1738_s14 = smov %s1594_s30 }
 0x580   : > { %s1739_s15 = smov %s1583_s27  ;;  %16 = sbr.rel (!%p14_p9) target bundleno = 4 (0x4), region = 85 }
 0x587   :  { %783 = vsyncpa [#allocation3], 1 }
 0x588   :  { %785 = vsyncpa [#allocation3 + $0x1], 1 }
 0x589   :  { %786 = vsyncpa [#allocation5], 1 }

</bundles_post_ra>
